<compile_context>
chip_gen: v7x
topology: tpu7x:2x2x1
jax: 0.10.0
libtpu: 0.0.40
codegen_flags: <defaults>
</compile_context>

<pallas_src>
import jax
import jax.numpy as jnp
from jax.experimental import pallas as pl
from jax.experimental.pallas import tpu as pltpu


# ------------------------------ Pallas kernel ------------------------------

def _enhancement_kernel(coef_ref,            # SMEM (8,) f32: [c1, c2, b_th, b_g, b_ph, 0, 0, 0]
                        x_ref,               # VMEM (C, HW) f32   channel-major slab of x
                        x1_ref, x2_ref,      # VMEM (C, HW) bf16  channel-major slabs of x1/x2
                        wtg_ref,             # VMEM (8, C)  f32   row0 = w_theta, row1 = w_g
                        wph_ref,             # VMEM (8, C)  bf16  row0 = w_phi
                        wW_ref, bW_ref,      # VMEM (C, 1)  f32   BN-folded 1->C conv weight/bias
                        o_ref):              # VMEM (C, HW) f32
    c1 = coef_ref[0]          # b * clamp(a, 0, 1) / N
    c2 = coef_ref[1]          # b * (1 - clamp(a, 0, 1)) / N
    b_th = coef_ref[2]
    b_g = coef_ref[3]
    b_ph = coef_ref[4]

    # One fused skinny matmul for theta & g: (8, C) @ (C, HW) -> (8, HW).
    tg = jnp.dot(wtg_ref[...], x_ref[...], preferred_element_type=jnp.float32)
    theta = tg[0:1, :] + b_th                                           # (1, HW)
    g = tg[1:2, :] + b_g                                                # (1, HW)

    # phi over x1 / x2 (bf16 operands, f32 accumulation on the MXU).
    phi1 = jnp.dot(wph_ref[...], x1_ref[...],
                   preferred_element_type=jnp.float32)[0:1, :] + b_ph   # (1, HW)
    phi2 = jnp.dot(wph_ref[...], x2_ref[...],
                   preferred_element_type=jnp.float32)[0:1, :] + b_ph   # (1, HW)

    # inter_channels == 1  =>  f_div_C is rank-1, so
    #   y = theta * (c1 * <phi1, g> + c2 * <phi2, g>)
    # and the HWxHW attention matrix is never materialized.
    s1 = jnp.sum(phi1 * g)
    s2 = jnp.sum(phi2 * g)
    y = theta * (c1 * s1 + c2 * s2)                                     # (1, HW)

    # W(y): 1x1 conv 1 -> C with folded BatchNorm, then residual add z = W_y + x.
    # x is re-read from the ref here (not held live across the matmuls).
    o_ref[...] = y * wW_ref[...] + bW_ref[...] + x_ref[...]             # (C, HW)


# --------------------------------- wrapper ----------------------------------

def enhancement_forward(x, x1, x2, params, eps=1e-5):
    """x, x1, x2: (B, C, H, W) NCHW float32. Returns z = W(y) + x, NCHW."""
    B, C, H, W = x.shape
    HW = H * W

    # Channel-major slabs: a free reshape of NCHW (no transpose, no extra HBM
    # pass).  x1/x2 only feed the scalar reductions -> bf16 halves their reads.
    xf = x.reshape(B, C, HW).astype(jnp.float32)
    x1f = x1.reshape(B, C, HW).astype(jnp.bfloat16)
    x2f = x2.reshape(B, C, HW).astype(jnp.bfloat16)

    # Fold clamp(a,0,1), b and the 1/N normalizations into two scalars; ship
    # all runtime scalars through SMEM.
    a = jnp.clip(params["a"], 0.0, 1.0)
    b = params["b"]
    n = jnp.float32(HW)                      # N1 == N2 == H*W
    zero = jnp.float32(0.0)
    coefs = jnp.stack([b * a / n, b * (1.0 - a) / n,
                       params["b_theta"], params["b_g"], params["b_phi"],
                       zero, zero, zero]).astype(jnp.float32)            # (8,)

    # Stack w_theta / w_g into one (8, C) LHS so a single MXU dot yields both
    # projections (rows padded to 8 sublanes).  w_phi sits in row 0 of its own
    # (8, C) bf16 LHS.
    wtg = (jnp.zeros((8, C), jnp.float32)
           .at[0].set(params["w_theta"].astype(jnp.float32))
           .at[1].set(params["w_g"].astype(jnp.float32)))
    wph = (jnp.zeros((8, C), jnp.float32)
           .at[0].set(params["w_phi"].astype(jnp.float32))).astype(jnp.bfloat16)

    # Fold BatchNorm (eval-mode running stats) into the 1 -> C output conv.
    scale = params["bn_gamma"] / jnp.sqrt(params["bn_var"] + eps)
    w_fold = (params["w_W"] * scale).reshape(C, 1).astype(jnp.float32)
    b_fold = ((params["b_W"] - params["bn_mean"]) * scale
              + params["bn_beta"]).reshape(C, 1).astype(jnp.float32)

    act_spec = pl.BlockSpec((None, C, HW), lambda bi: (bi, 0, 0))
    w_row_spec = pl.BlockSpec((8, C), lambda bi: (0, 0))
    w_col_spec = pl.BlockSpec((C, 1), lambda bi: (0, 0))
    coef_spec = pl.BlockSpec(memory_space=pltpu.MemorySpace.SMEM)

    # Explicit VMEM budget: double-buffered x (f32) + x1/x2 (bf16) + out (f32)
    # slabs plus the tiny weight tiles; capped at 64 MiB so it stays legal on
    # v7x (64 MiB physical VMEM per TensorCore).
    slab_f32 = C * HW * 4
    slab_bf16 = C * HW * 2
    per_step = 2 * (2 * slab_f32 + 2 * slab_bf16) + 2 * (8 * C * 4) + 2 * (C * 4)
    vmem_limit = int(min(max(per_step + (4 << 20), 32 << 20), 64 << 20))
    # TODO(synk): for large H*W (e.g. C=256, 64x64) add an HW-tiled two-pass
    # scheme (pass 1 accumulates <phi,g> per HW tile, pass 2 applies), which
    # also gives each v7x core multiple grid steps to pipeline.

    out = pl.pallas_call(
        _enhancement_kernel,
        out_shape=jax.ShapeDtypeStruct((B, C, HW), jnp.float32),
        grid_spec=pltpu.PrefetchScalarGridSpec(
            num_scalar_prefetch=0,
            grid=(B,),
            in_specs=[coef_spec,
                      act_spec, act_spec, act_spec,
                      w_row_spec, w_row_spec,
                      w_col_spec, w_col_spec],
            out_specs=act_spec,
        ),
        compiler_params=pltpu.CompilerParams(
            dimension_semantics=("parallel",),
            vmem_limit_bytes=vmem_limit),
    )(coefs, xf, x1f, x2f, wtg, wph, w_fold, b_fold)

    return out.reshape(B, C, H, W)


# ---------------------- deterministic parameter builder ---------------------

def make_params(key, in_channels):
    C = in_channels
    ks = jax.random.split(key, 14)
    std = 1.0 / (C ** 0.5)          # ~ PyTorch default conv init scale
    # NOTE: the PyTorch module zero-inits the BN gamma/beta inside W (making
    # W_y == 0 at init).  Random values are used here so the demo exercises the
    # full computation; forward semantics are identical for any parameters.
    return {
        "w_g":     jax.random.uniform(ks[0], (C,), jnp.float32, -std, std),
        "b_g":     jax.random.uniform(ks[1], (), jnp.float32, -std, std),
        "w_theta": jax.random.uniform(ks[2], (C,), jnp.float32, -std, std),
        "b_theta": jax.random.uniform(ks[3], (), jnp.float32, -std, std),
        "w_phi":   jax.random.uniform(ks[4], (C,), jnp.float32, -std, std),
        "b_phi":   jax.random.uniform(ks[5], (), jnp.float32, -std, std),
        "w_W":     jax.random.uniform(ks[6], (C,), jnp.float32, -1.0, 1.0),
        "b_W":     jax.random.uniform(ks[7], (C,), jnp.float32, -1.0, 1.0),
        "bn_gamma": jax.random.uniform(ks[8], (C,), jnp.float32, 0.5, 1.5),
        "bn_beta":  jax.random.normal(ks[9], (C,), jnp.float32) * 0.1,
        "bn_mean":  jax.random.normal(ks[10], (C,), jnp.float32) * 0.1,
        "bn_var":   jax.random.uniform(ks[11], (C,), jnp.float32, 0.5, 1.5),
        "a": jax.random.uniform(ks[12], (), jnp.float32),
        "b": jax.random.uniform(ks[13], (), jnp.float32),
    }


# --------------------------- plain-JAX reference ----------------------------

def enhancement_reference(x, x1, x2, p, eps=1e-5):
    """Literal transcription of the PyTorch forward (forms the HWxHW matrix)."""
    B, C, H, W = x.shape
    HW = H * W

    def conv_c_to_1(t, w, bias):                       # (B,C,H,W) -> (B,1,HW)
        return jnp.einsum("c,bcn->bn", w, t.reshape(B, C, HW))[:, None, :] + bias

    g_x = conv_c_to_1(x, p["w_g"], p["b_g"]).transpose(0, 2, 1)        # (B,HW,1)
    theta_x = conv_c_to_1(x, p["w_theta"], p["b_theta"]).transpose(0, 2, 1)
    phi_x1 = conv_c_to_1(x1, p["w_phi"], p["b_phi"])                   # (B,1,HW)
    phi_x2 = conv_c_to_1(x2, p["w_phi"], p["b_phi"])

    f_div_C1 = jnp.matmul(theta_x, phi_x1) / phi_x1.shape[-1]
    f_div_C2 = jnp.matmul(theta_x, phi_x2) / phi_x2.shape[-1]
    a = jnp.clip(p["a"], 0.0, 1.0)
    f_div_C = p["b"] * (a * f_div_C1 + (1.0 - a) * f_div_C2)
    y = jnp.matmul(f_div_C, g_x).transpose(0, 2, 1).reshape(B, 1, H, W)

    scale = p["bn_gamma"] / jnp.sqrt(p["bn_var"] + eps)
    w_fold = (p["w_W"] * scale)[None, :, None, None]
    b_fold = ((p["b_W"] - p["bn_mean"]) * scale + p["bn_beta"])[None, :, None, None]
    return y * w_fold + b_fold + x


# ------------------------------------ main -----------------------------------

if __name__ == "__main__":
    key = jax.random.PRNGKey(0)
    kp, kx, k1, k2 = jax.random.split(key, 4)

    B, C, H, W = 2, 128, 16, 16          # C sublane-friendly; HW = 256 lane-dense
    params = make_params(kp, C)
    x = jax.random.normal(kx, (B, C, H, W), jnp.float32)
    x1 = jax.random.normal(k1, (B, C, H, W), jnp.float32)
    x2 = jax.random.normal(k2, (B, C, H, W), jnp.float32)

    out = enhancement_forward(x, x1, x2, params)
    out = jax.block_until_ready(out)

    assert out.shape == (B, C, H, W), out.shape
    assert bool(jnp.all(jnp.isfinite(out)))

    # Numerical check against the literal (HWxHW) formulation.  Tolerance is
    # loose because TPU f32 matmuls use bf16 MXU passes at default precision
    # and x1/x2 are deliberately read as bf16 (they only feed tiny scalar
    # attention coefficients, so the effect on the output is ~1e-4).
    ref = enhancement_reference(x, x1, x2, params)
    assert bool(jnp.allclose(out, ref, rtol=2e-2, atol=2e-2)), \
        float(jnp.max(jnp.abs(out - ref)))

    print("KERNEL_OK")
</pallas_src>

<mosaic_0001>
module attributes {stable_mosaic.version = 11 : i64} {
  func.func @_enhancement_kernel(%arg0: i32, %arg1: memref<8xf32, #tpu.memory_space<smem>>, %arg2: memref<1x128x256xf32, #tpu.memory_space<vmem>>, %arg3: memref<1x128x256xbf16, #tpu.memory_space<vmem>>, %arg4: memref<1x128x256xbf16, #tpu.memory_space<vmem>>, %arg5: memref<8x128xf32, #tpu.memory_space<vmem>>, %arg6: memref<8x128xbf16, #tpu.memory_space<vmem>>, %arg7: memref<128x1xf32, #tpu.memory_space<vmem>>, %arg8: memref<128x1xf32, #tpu.memory_space<vmem>>, %arg9: memref<1x128x256xf32, #tpu.memory_space<vmem>>) attributes {dimension_semantics = [#tpu.dimension_semantics<parallel>], iteration_bounds = array<i64: 2>, scalar_prefetch = 0 : i64, scratch_operands = 0 : i64, tpu.core_type = #tpu.core_type<tc>, window_params = [{transform_indices = @transform_0, window_bounds = array<i64: 8>}, {transform_indices = @transform_1, window_bounds = array<i64: 1, 128, 256>}, {transform_indices = @transform_2, window_bounds = array<i64: 1, 128, 256>}, {transform_indices = @transform_3, window_bounds = array<i64: 1, 128, 256>}, {pipeline_mode = #tpu.pipeline_mode<synchronous>, transform_indices = @transform_4, window_bounds = array<i64: 8, 128>}, {pipeline_mode = #tpu.pipeline_mode<synchronous>, transform_indices = @transform_5, window_bounds = array<i64: 8, 128>}, {pipeline_mode = #tpu.pipeline_mode<synchronous>, transform_indices = @transform_6, window_bounds = array<i64: 128, 1>}, {pipeline_mode = #tpu.pipeline_mode<synchronous>, transform_indices = @transform_7, window_bounds = array<i64: 128, 1>}, {transform_indices = @transform_8, window_bounds = array<i64: 1, 128, 256>}]} {
    %c0 = arith.constant 0 : index
    %0 = memref.load %arg1[%c0] : memref<8xf32, #tpu.memory_space<smem>>
    %c1 = arith.constant 1 : index
    %1 = memref.load %arg1[%c1] : memref<8xf32, #tpu.memory_space<smem>>
    %c2 = arith.constant 2 : index
    %2 = memref.load %arg1[%c2] : memref<8xf32, #tpu.memory_space<smem>>
    %c3 = arith.constant 3 : index
    %3 = memref.load %arg1[%c3] : memref<8xf32, #tpu.memory_space<smem>>
    %c4 = arith.constant 4 : index
    %4 = memref.load %arg1[%c4] : memref<8xf32, #tpu.memory_space<smem>>
    %c0_0 = arith.constant 0 : index
    %c0_1 = arith.constant 0 : index
    %5 = vector.load %arg5[%c0_0, %c0_1] : memref<8x128xf32, #tpu.memory_space<vmem>>, vector<8x128xf32>
    %c0_2 = arith.constant 0 : index
    %c0_3 = arith.constant 0 : index
    %c0_4 = arith.constant 0 : index
    %6 = vector.load %arg2[%c0_2, %c0_3, %c0_4] : memref<1x128x256xf32, #tpu.memory_space<vmem>>, vector<1x128x256xf32>
    %7 = vector.shape_cast %6 : vector<1x128x256xf32> to vector<128x256xf32>
    %cst = arith.constant dense<0.000000e+00> : vector<8x256xf32>
    %8 = tpu.matmul %5, %7, %cst {dimension_numbers = #tpu.dot_dimension_numbers<[1], [0], [0], [1], [0, 0, 1, 1], [], []>} : vector<8x128xf32>, vector<128x256xf32>, vector<8x256xf32> -> vector<8x256xf32>
    %9 = vector.extract_strided_slice %8 {offsets = [0, 0], sizes = [1, 256], strides = [1, 1]} : vector<8x256xf32> to vector<1x256xf32>
    %10 = vector.broadcast %2 : f32 to vector<1x256xf32>
    %11 = arith.addf %9, %10 : vector<1x256xf32>
    %12 = vector.extract_strided_slice %8 {offsets = [1, 0], sizes = [1, 256], strides = [1, 1]} : vector<8x256xf32> to vector<1x256xf32>
    %13 = vector.broadcast %3 : f32 to vector<1x256xf32>
    %14 = arith.addf %12, %13 : vector<1x256xf32>
    %c0_5 = arith.constant 0 : index
    %c0_6 = arith.constant 0 : index
    %15 = vector.load %arg6[%c0_5, %c0_6] : memref<8x128xbf16, #tpu.memory_space<vmem>>, vector<8x128xbf16>
    %c0_7 = arith.constant 0 : index
    %c0_8 = arith.constant 0 : index
    %c0_9 = arith.constant 0 : index
    %16 = vector.load %arg3[%c0_7, %c0_8, %c0_9] : memref<1x128x256xbf16, #tpu.memory_space<vmem>>, vector<1x128x256xbf16>
    %17 = vector.shape_cast %16 : vector<1x128x256xbf16> to vector<128x256xbf16>
    %cst_10 = arith.constant dense<0.000000e+00> : vector<8x256xf32>
    %18 = tpu.matmul %15, %17, %cst_10 {dimension_numbers = #tpu.dot_dimension_numbers<[1], [0], [0], [1], [0, 0, 1, 1], [], []>} : vector<8x128xbf16>, vector<128x256xbf16>, vector<8x256xf32> -> vector<8x256xf32>
    %19 = vector.extract_strided_slice %18 {offsets = [0, 0], sizes = [1, 256], strides = [1, 1]} : vector<8x256xf32> to vector<1x256xf32>
    %20 = vector.broadcast %4 : f32 to vector<1x256xf32>
    %21 = arith.addf %19, %20 : vector<1x256xf32>
    %c0_11 = arith.constant 0 : index
    %c0_12 = arith.constant 0 : index
    %22 = vector.load %arg6[%c0_11, %c0_12] : memref<8x128xbf16, #tpu.memory_space<vmem>>, vector<8x128xbf16>
    %c0_13 = arith.constant 0 : index
    %c0_14 = arith.constant 0 : index
    %c0_15 = arith.constant 0 : index
    %23 = vector.load %arg4[%c0_13, %c0_14, %c0_15] : memref<1x128x256xbf16, #tpu.memory_space<vmem>>, vector<1x128x256xbf16>
    %24 = vector.shape_cast %23 : vector<1x128x256xbf16> to vector<128x256xbf16>
    %cst_16 = arith.constant dense<0.000000e+00> : vector<8x256xf32>
    %25 = tpu.matmul %22, %24, %cst_16 {dimension_numbers = #tpu.dot_dimension_numbers<[1], [0], [0], [1], [0, 0, 1, 1], [], []>} : vector<8x128xbf16>, vector<128x256xbf16>, vector<8x256xf32> -> vector<8x256xf32>
    %26 = vector.extract_strided_slice %25 {offsets = [0, 0], sizes = [1, 256], strides = [1, 1]} : vector<8x256xf32> to vector<1x256xf32>
    %27 = vector.broadcast %4 : f32 to vector<1x256xf32>
    %28 = arith.addf %26, %27 : vector<1x256xf32>
    %29 = arith.mulf %21, %14 : vector<1x256xf32>
    %30 = vector.shape_cast %29 : vector<1x256xf32> to vector<1x1x256xf32>
    %cst_17 = arith.constant dense<0.000000e+00> : vector<1xf32>
    %31 = vector.multi_reduction <add>, %30, %cst_17 [1, 2] : vector<1x1x256xf32> to vector<1xf32>
    %32 = vector.shape_cast %31 : vector<1xf32> to vector<1x1x1xf32>
    %33 = vector.extract %32[0, 0, 0] : f32 from vector<1x1x1xf32>
    %34 = arith.mulf %28, %14 : vector<1x256xf32>
    %35 = vector.shape_cast %34 : vector<1x256xf32> to vector<1x1x256xf32>
    %cst_18 = arith.constant dense<0.000000e+00> : vector<1xf32>
    %36 = vector.multi_reduction <add>, %35, %cst_18 [1, 2] : vector<1x1x256xf32> to vector<1xf32>
    %37 = vector.shape_cast %36 : vector<1xf32> to vector<1x1x1xf32>
    %38 = vector.extract %37[0, 0, 0] : f32 from vector<1x1x1xf32>
    %39 = arith.mulf %0, %33 : f32
    %40 = arith.mulf %1, %38 : f32
    %41 = arith.addf %39, %40 : f32
    %42 = vector.broadcast %41 : f32 to vector<1x256xf32>
    %43 = arith.mulf %11, %42 : vector<1x256xf32>
    %c0_19 = arith.constant 0 : index
    %c0_20 = arith.constant 0 : index
    %44 = vector.load %arg7[%c0_19, %c0_20] : memref<128x1xf32, #tpu.memory_space<vmem>>, vector<128x1xf32>
    %45 = vector.broadcast %43 : vector<1x256xf32> to vector<128x256xf32>
    %46 = vector.broadcast %44 : vector<128x1xf32> to vector<128x256xf32>
    %47 = arith.mulf %45, %46 : vector<128x256xf32>
    %c0_21 = arith.constant 0 : index
    %c0_22 = arith.constant 0 : index
    %48 = vector.load %arg8[%c0_21, %c0_22] : memref<128x1xf32, #tpu.memory_space<vmem>>, vector<128x1xf32>
    %49 = vector.broadcast %48 : vector<128x1xf32> to vector<128x256xf32>
    %50 = arith.addf %47, %49 : vector<128x256xf32>
    %c0_23 = arith.constant 0 : index
    %c0_24 = arith.constant 0 : index
    %c0_25 = arith.constant 0 : index
    %51 = vector.load %arg2[%c0_23, %c0_24, %c0_25] : memref<1x128x256xf32, #tpu.memory_space<vmem>>, vector<1x128x256xf32>
    %52 = vector.shape_cast %51 : vector<1x128x256xf32> to vector<128x256xf32>
    %53 = arith.addf %50, %52 : vector<128x256xf32>
    %c0_26 = arith.constant 0 : index
    %c0_27 = arith.constant 0 : index
    %c0_28 = arith.constant 0 : index
    %54 = vector.load %arg9[%c0_26, %c0_27, %c0_28] : memref<1x128x256xf32, #tpu.memory_space<vmem>>, vector<1x128x256xf32>
    %55 = vector.shape_cast %54 : vector<1x128x256xf32> to vector<128x256xf32>
    %56 = vector.shape_cast %53 : vector<128x256xf32> to vector<1x128x256xf32>
    tpu.vector_store %arg9[%c0_26, %c0_27, %c0_28], %56 {strides = array<i32>} : memref<1x128x256xf32, #tpu.memory_space<vmem>>, vector<1x128x256xf32>,
    return
  }
  func.func @transform_0(%arg0: i32) -> i32 {
    %c0_i32 = arith.constant 0 : i32
    %c0_i32_0 = arith.constant 0 : i32
    return %c0_i32 : i32
  }
  func.func @transform_1(%arg0: i32) -> (i32, i32, i32) {
    %c0_i32 = arith.constant 0 : i32
    %c0_i32_0 = arith.constant 0 : i32
    %c0_i32_1 = arith.constant 0 : i32
    return %arg0, %c0_i32, %c0_i32_0 : i32, i32, i32
  }
  func.func @transform_2(%arg0: i32) -> (i32, i32, i32) {
    %c0_i32 = arith.constant 0 : i32
    %c0_i32_0 = arith.constant 0 : i32
    %c0_i32_1 = arith.constant 0 : i32
    return %arg0, %c0_i32, %c0_i32_0 : i32, i32, i32
  }
  func.func @transform_3(%arg0: i32) -> (i32, i32, i32) {
    %c0_i32 = arith.constant 0 : i32
    %c0_i32_0 = arith.constant 0 : i32
    %c0_i32_1 = arith.constant 0 : i32
    return %arg0, %c0_i32, %c0_i32_0 : i32, i32, i32
  }
  func.func @transform_4(%arg0: i32) -> (i32, i32) {
    %c0_i32 = arith.constant 0 : i32
    %c0_i32_0 = arith.constant 0 : i32
    %c0_i32_1 = arith.constant 0 : i32
    return %c0_i32, %c0_i32_0 : i32, i32
  }
  func.func @transform_5(%arg0: i32) -> (i32, i32) {
    %c0_i32 = arith.constant 0 : i32
    %c0_i32_0 = arith.constant 0 : i32
    %c0_i32_1 = arith.constant 0 : i32
    return %c0_i32, %c0_i32_0 : i32, i32
  }
  func.func @transform_6(%arg0: i32) -> (i32, i32) {
    %c0_i32 = arith.constant 0 : i32
    %c0_i32_0 = arith.constant 0 : i32
    %c0_i32_1 = arith.constant 0 : i32
    return %c0_i32, %c0_i32_0 : i32, i32
  }
  func.func @transform_7(%arg0: i32) -> (i32, i32) {
    %c0_i32 = arith.constant 0 : i32
    %c0_i32_0 = arith.constant 0 : i32
    %c0_i32_1 = arith.constant 0 : i32
    return %c0_i32, %c0_i32_0 : i32, i32
  }
  func.func @transform_8(%arg0: i32) -> (i32, i32, i32) {
    %c0_i32 = arith.constant 0 : i32
    %c0_i32_0 = arith.constant 0 : i32
    %c0_i32_1 = arith.constant 0 : i32
    return %arg0, %c0_i32, %c0_i32_0 : i32, i32, i32
  }
}

</mosaic_0001>

<bundles_post_ra>
// kernel: tpu_custom_call.1
= control target key start
LH: loop header
LB: loop body
LE: loop exit
PB: predicated region body
PF: predicated region fallthrough
CT: control target
= control target key end

     0   :  { %s2377_s0 = inlined_call_operand.hbm [shape: f32[8], index: 0, kind: input, shape index: {}]   ;;  %s2378_s1 = inlined_call_operand.hbm [shape: f32[2,128,256], index: 1, kind: input, shape index: {}]   ;;  %s2379_s2 = inlined_call_operand.vmem [shape: bf16[2,128,256], index: 2, kind: input, shape index: {}]   ;;  %s2380_s3 = inlined_call_operand.hbm [shape: bf16[2,128,256], index: 3, kind: input, shape index: {}]   ;;  %s2381_s4 = inlined_call_operand.vmem [shape: f32[8,128], index: 4, kind: input, shape index: {}]   ;;  %s2382_s5 = inlined_call_operand.vmem [shape: bf16[8,128], index: 5, kind: input, shape index: {}]   ;;  %s2383_s6 = inlined_call_operand.vmem [shape: f32[128,1], index: 6, kind: input, shape index: {}]   ;;  %s2384_s7 = inlined_call_operand.vmem [shape: f32[128,1], index: 7, kind: input, shape index: {}]   ;;  %s2385_s8 = inlined_call_operand.hbm [shape: f32[2,128,256], index: 8, kind: output, shape index: {}]  }
   0x1   :  { %2418 = sst [smem:[#allocation43_spill]] %s2377_s0 }
   0x2   :  { %2419 = sst [smem:[#allocation44_spill]] %s2378_s1 }
   0x3   :  { %13 = vsyncpa [#allocation5], 0 }
   0x4   :  { %14 = vsyncpa [#allocation3], 0 }
   0x5   :  { %16 = vsyncpa [#allocation3 + $0x1], 0 }
   0x6   :  { %17 = vsyncpa [#allocation8], 0 }
   0x7   :  { %19 = vsyncpa [#allocation8 + $0x1], 0 }
   0x8   :  { %20 = vsyncpa [#allocation4], 0 }
   0x9   :  { %22 = vsyncpa [#allocation4 + $0x1], 0  ;;  %s1719_s27 = smov 0   ;;  %s1721_s28 = smov 0  }
   0xa   :  { %s1723_s29 = smov 0   ;;  %s1725_s30 = smov 0  }
   0xb LB: > { %2420 = sst [smem:[#allocation14_spill]] %s1656_s29  ;;  %s1740_s9 = sadd.s32 4294967295, %s1660_s30   ;;  %s1660_s30 = sphi %s1725_s30, %s2490_s30   ;;  %s1656_s29 = sphi %s1723_s29, %s2492_s29   ;;  %s1652_s28 = sphi %s1721_s28, %s2494_s28   ;;  %s1648_s27 = sphi %s1719_s27, %s2493_s27  }
   0xc   : > { %s1295_s10 = sadd.s32 4294967294, %s1660_s30   ;;  %s1744_s11 = sadd.s32 1, %s1660_s30  }
   0xd   : > { %2421 = sst [smem:[#allocation15_spill]] %s1744_s11  ;;  %s56_s12 = sadd.s32 1, %s1656_s29 }
   0xe   : > { %s53_s13 = ssub.s32 %s1660_s30, %s1744_s11  ;;  %p63_p0 = scmp.ne.s32.totalorder %s1656_s29, %s1652_s28 }
   0xf   : > { %p54_p1 = scmp.eq.s32.totalorder %s53_s13, 0  ;;  %p64_p2 = scmp.eq.s32.totalorder %s1660_s30, 0 }
  0x10   : > { %p69_p3 = scmp.ne.s32.totalorder %s1652_s28, %s1648_s27  ;;  %p2386_p4 = scmp.eq.s32.totalorder %s1740_s9, 0 }
  0x11   : > { %s1756_s14 = scalar_select %p54_p1, %s1656_s29, %s56_s12  }
  0x12   : > { %p1758_p5 = por %p64_p2, %p63_p0  ;;  %p1764_p6 = por %p2386_p4, %p69_p3 }
  0x13   : > { %2422 = sst [smem:[#allocation16_spill]] %s1756_s14  ;;  %p229_p7 = scmp.eq.s32.totalorder %s1740_s9, 1 }
  0x14   : > { %s2424_s16 = scalar_select %p1764_p6, 1, 0 }
  0x15   : > { %p235_p8 = scmp.eq.s32.totalorder %s1295_s10, 1  ;;  %p1296_p9 = scmp.ge.s32.totalorder %s1660_s30, 1 }
  0x16   : > { %p242_p10 = scmp.lt.s32.totalorder %s1660_s30, 3  ;;  %p1771_p11 = por %p229_p7, %p63_p0 }
  0x17   : > { %p1775_p12 = por %p235_p8, %p69_p3  ;;  %p1419_p4 = scmp.lt.s32.totalorder %s1660_s30, 2 }
  0x18   : > { %s2425_s17 = scalar_select %p1771_p11, 1, 0 }
  0x19   : > { %s2426_s18 = scalar_select %p1775_p12, 1, 0 }
  0x1a   : > { %p1779_p13 = pnand %p1296_p9, %p242_p10  ;;  %s1788_s20 = sand.u32 1, %s1656_s29  }
  0x1b   : > { %s1353_s21 = sshll.u32 %s1660_s30, 12  ;;  %p2428_p0 = scmp.eq.s32.totalorder %s1740_s9, 0 }
  0x1c   : > { %p1403_p2 = pneg %p1779_p13  ;;  %p1795_p3 = pnand %p1419_p4, %p1758_p5 }
  0x1d   : > { %s1299_s23 = sshll.u32 %s1788_s20, 8  ;;  %s2430_s0 = sld [smem:[#allocation43_spill]] }
  0x1e   : > { %p1404_p7 = pnand %p1403_p2, %p2428_p0 }
  0x20   : > { %p1515_p9 = pneg %p1404_p7 }
  0x23   : > { %s1513_s26 = scalar_lea.hbm %s2430_s0, 16 }
  0x24   : > { %p1514_p8 = scmp.ne.s32.totalorder %s2430_s0, %s1513_s26  ;;  %p1520_p2 = scmp.lt.u32.totalorder %s1513_s26, %s2430_s0 }
  0x26   : > { %p1516_p10 = pnand %p1515_p9, %p1514_p8 }
  0x28   : > { %p1517_p1 = pneg %p1516_p10 }
  0x2a   : > { %p1522_p4 = pnand %p1520_p2, %p1517_p1 }
  0x2c   : > { %1525 = shalt.err (!%p1522_p4)
}
  0x2d   : > { %s1662_s15 = smov [#allocation2]   ;;  %s2431_s1 = sld [smem:[#allocation44_spill]] }
  0x2e   : > { %1406 = dma.hbm_to_smem (!%p1404_p7), %s2430_s0, 16, %s1662_s15, [#allocation5]  }
  0x2f   : > { %s280_s14 = scalar_lea.vmem [#allocation6], %s1299_s23  ;;  %s277_s12 = scalar_lea.sflag [#allocation3], %s1788_s20 }
  0x30   : > { %s287_s26 = sshll.u32 %s280_s14, 4  ;;  %p1528_p1 = pneg %p1795_p3  ;;  %s1817_s26 = int_to_ptr.vmem [resolvable:$true] %s287_s26 }
  0x33   : > { %s1815_s10 = scalar_lea.hbm %s2431_s1, %s1353_s21  ;;  %s1531_s21 = scalar_lea.hbm %s2431_s1, 8192 }
  0x34   : > { %s1526_s13 = scalar_lea.hbm %s1815_s10, 4096  ;;  %p1532_p8 = scmp.lt.u32.totalorder %s1815_s10, %s2431_s1 }
  0x35   : > { %p1527_p5 = scmp.ne.s32.totalorder %s1815_s10, %s1526_s13  ;;  %p1533_p9 = scmp.lt.u32.totalorder %s1531_s21, %s1526_s13 }
  0x36   : > { %p1535_p2 = scmp.lt.u32.totalorder %s1526_s13, %s1815_s10 }
  0x37   : > { %p1529_p0 = pnand %p1528_p1, %p1527_p5  ;;  %p1534_p10 = por %p1533_p9, %p1532_p8 }
  0x39   : > { %p1530_p7 = pneg %p1529_p0  ;;  %p1536_p4 = por %p1535_p2, %p1534_p10 }
  0x3b   : > { %p1537_p12 = pnand %p1536_p4, %p1530_p7 }
  0x3d   : > { %1540 = shalt.err (!%p1537_p12)
}
  0x3e   : > { %s1541_s23 = scalar_lea.vmem %s1817_s26, 4096  ;;  %s1663_s25 = smov [#allocation6]  }
  0x3f   : > { %p1542_p5 = scmp.ne.s32.totalorder %s1817_s26, %s1541_s23  ;;  %s1546_s14 = sshll.u32 %s1663_s25, 4  ;;  %s1547_s14 = int_to_ptr.vmem [resolvable:$false] %s1546_s14 }
  0x40   : > { %s1548_s29 = scalar_lea.vmem %s1547_s14, 8192  ;;  %p1549_p6 = scmp.lt.s32.totalorder %s1817_s26, %s1547_s14 }
  0x41   : > { %p1544_p0 = pnand %p1542_p5, %p1528_p1  ;;  %p1550_p8 = scmp.lt.s32.totalorder %s1548_s29, %s1541_s23 }
  0x43   : > { %p1545_p11 = pneg %p1544_p0  ;;  %p1551_p9 = por %p1550_p8, %p1549_p6 }
  0x45   : > { %p1552_p10 = pnand %p1551_p9, %p1545_p11 }
  0x47   : > { %1555 = shalt.err (!%p1552_p10)
}
  0x48   : > { %s1664_s13 = smov 256   ;;  %s1665_s11 = smov 16  }
  0x49   : > { %1410 = dma.hbm_to_vmem [thread:$0]  (!%p1795_p3), %s1815_s10, 4096, %s1817_s26, %s277_s12, %s1664_s13, %s1664_s13, %s1665_s11  }
  0x4a   : > { %s1302_s21 = sshll.u32 %s1788_s20, 7  ;;  %s1354_s15 = sshll.u32 %s1660_s30, 11 }
  0x4b   : > { %s1852_s25 = scalar_lea.hbm %s2380_s3, %s1354_s15  ;;  %s309_s14 = scalar_lea.vmem [#allocation7], %s1302_s21 }
  0x4c   : > { %s316_s29 = sshll.u32 %s309_s14, 4  ;;  %s306_s0 = scalar_lea.sflag [#allocation8], %s1788_s20  ;;  %s1854_s29 = int_to_ptr.vmem [resolvable:$true] %s316_s29 }
  0x4d   : > { %s1556_s1 = scalar_lea.hbm %s1852_s25, 2048  ;;  %s1561_s12 = scalar_lea.hbm %s2380_s3, 4096 }
  0x4e   : > { %p1557_p6 = scmp.ne.s32.totalorder %s1852_s25, %s1556_s1  ;;  %p1562_p7 = scmp.lt.u32.totalorder %s1852_s25, %s2380_s3 }
  0x4f   : > { %p1563_p2 = scmp.lt.u32.totalorder %s1561_s12, %s1556_s1  ;;  %p1565_p5 = scmp.lt.u32.totalorder %s1556_s1, %s1852_s25 }
  0x50   : > { %p1559_p11 = pnand %p1557_p6, %p1528_p1 }
  0x51   : > { %p1564_p4 = por %p1563_p2, %p1562_p7 }
  0x52   : > { %p1560_p12 = pneg %p1559_p11 }
  0x53   : > { %p1566_p0 = por %p1565_p5, %p1564_p4 }
  0x55   : > { %p1567_p8 = pnand %p1566_p0, %p1560_p12 }
  0x57   : > { %1570 = shalt.err (!%p1567_p8)
}
  0x58   : > { %s1571_s21 = scalar_lea.vmem %s1854_s29, 2048  ;;  %s1666_s15 = smov [#allocation7]  }
  0x59   : > { %p1572_p9 = scmp.ne.s32.totalorder %s1854_s29, %s1571_s21  ;;  %s1576_s24 = sshll.u32 %s1666_s15, 4  ;;  %s1577_s24 = int_to_ptr.vmem [resolvable:$false] %s1576_s24 }
  0x5a   : > { %s1578_s23 = scalar_lea.vmem %s1577_s24, 4096  ;;  %p1579_p11 = scmp.lt.s32.totalorder %s1854_s29, %s1577_s24 }
  0x5b   : > { %p1574_p10 = pnand %p1572_p9, %p1528_p1  ;;  %p1580_p7 = scmp.lt.s32.totalorder %s1578_s23, %s1571_s21 }
  0x5d   : > { %p1575_p6 = pneg %p1574_p10  ;;  %p1581_p2 = por %p1580_p7, %p1579_p11 }
  0x5f   : > { %p1582_p4 = pnand %p1581_p2, %p1575_p6 }
  0x61   : > { %1585 = shalt.err (!%p1582_p4)
}
  0x62   : > { %s1667_s1 = smov 128   ;;  %s1668_s14 = smov 8  }
  0x63   : > { %1413 = dma.hbm_to_vmem [thread:$0]  (!%p1795_p3), %s1852_s25, 2048, %s1854_s29, %s306_s0, %s1667_s1, %s1667_s1, %s1668_s14  }
  0x64   : > { %328 = sbr.rel (%p1779_p13) target bundleno = 668 (0x29c), region = 52 }
  0x6b   : > { %p2432_p1 = scmp.eq.s32.totalorder %s1740_s9, 0 }
  0x6d   : > { %1631 = dma.done.wait (%p2432_p1), [#allocation5], 16   ;;  %p2433_p12 = pmov %p2432_p1 }
  0x6e   : > { %s1889_s10 = sand.u32 1, %s1652_s28   ;;  %p2434_p3 = scmp.ne.s32.totalorder %s2424_s16, 0 }
  0x6f   : > { %1633 = vsyncadd (%p2433_p12), [#allocation5], 4294967280  ;;  %s1307_s26 = sshll.u32 %s1889_s10, 8  ;;  %s335_s22 = scalar_lea.sflag [#allocation3], %s1889_s10 }
  0x70   : > { %s1895_s0 = scalar_lea.vmem [#allocation6], %s1307_s26 }
  0x71   : > { %1635 = dma.done.wait (%p2434_p3), %s335_s22, 4096  }
  0x72   : > { %1637 = vsyncadd (%p2434_p3), %s335_s22, 4294963200  ;;  %s1308_s19 = sshll.u32 %s1889_s10, 7  ;;  %s344_s20 = scalar_lea.sflag [#allocation8], %s1889_s10 }
  0x73   : > { %s1903_s25 = scalar_lea.vmem [#allocation7], %s1308_s19 }
  0x74   : > { %1639 = dma.done.wait (%p2434_p3), %s344_s20, 2048  }
  0x75   : > { %1641 = vsyncadd (%p2434_p3), %s344_s20, 4294965248 }
  0x76   : > { %352 = sfence }
  0x77   : > { %v1910_v0 = vld [vmem:[%s1895_s0 + $0x8] sm:$0xff]  ;;  %v1913_v1 = vld [vmem:[%s1895_s0 + $0x18] sm:$0xff]  ;;  %v1916_v2 = vld [vmem:[%s1895_s0] sm:$0xff]  ;;  %p391_p13 = scmp.lt.s32.totalorder %s1740_s9, 1  ;;  %v1669_v7 = vmov 0.0   ;;  %v1670_v8 = vmov 0  }
  0x78   : > { %v1357_v3 = vpack.c.bf16 %v1913_v1, %v1910_v0  ;;  %v1922_v4 = vld [vmem:[%s1895_s0 + $0x10] sm:$0xff]  ;;  %v1925_v5 = vld [vmem:[%s1895_s0 + $0x28] sm:$0xff]  ;;  %v1928_v6 = vld [vmem:[%s1895_s0 + $0x38] sm:$0xff]  ;;  %499 = vmatprep.mubr.f32.mxu0 %v1669_v7  ;;  %641 = vmatprep.mubr.bf16.mxu1 %v1670_v8  ;;  %s1314_s15 = sld [smem:[#allocation2 + $0x3]]  ;;  %s1315_s24 = sld [smem:[#allocation2 + $0x4]]  ;;  %vm800_vm0 = vcmask 1040384  }
  0x79   : > { %2435 = vst [vmem:[#allocation17_spill] sm:$0xff] %v1928_v6  ;;  %v1359_v9 = vpack.c.bf16 %v1922_v4, %v1916_v2  ;;  %v1361_v10 = vpack.c.bf16 %v1928_v6, %v1925_v5  ;;  %v1936_v11 = vld [vmem:[%s1895_s0 + $0x20] sm:$0xff]  ;;  %v1939_v12 = vld [vmem:[%s1895_s0 + $0x30] sm:$0xff]  ;;  %s392_s16 = scalar_select %p391_p13, %s1740_s9, 1  ;;  %v1943_v13 = vld [vmem:[%s1895_s0 + $0x48] sm:$0xff]  ;;  %1463 = vset.pattern.permute.xlu1 %v1670_v8  ;;  %1464 = vset.pattern.permute.xlu0 %v1670_v8 }
  0x7a   : > { %2436 = vst [vmem:[#allocation18_spill] sm:$0xff] %v1939_v12  ;;  %2437 = vst [vmem:[#allocation19_spill] sm:$0xff] %v1943_v13  ;;  %1358 = vmatprep.subr.bf16.mxu0 %v1357_v3  ;;  %v1948_v14 = vld [vmem:[%s1895_s0 + $0x58] sm:$0xff]  ;;  %v1363_v15 = vpack.c.bf16 %v1939_v12, %v1936_v11  ;;  %v1953_v16 = vld [vmem:[%s1895_s0 + $0x40] sm:$0xff]  ;;  %s1313_s19 = sld [smem:[#allocation2 + $0x2]]  ;;  %s1312_s20 = sld [smem:[#allocation2 + $0x1]] }
  0x7b   : > { %2438 = vst [vmem:[#allocation20_spill] sm:$0xff] %v1948_v14  ;;  %1360 = vmatpush1.bf16.msra.mxu0 %v1359_v9  ;;  %s1355_s29 = sshll.u32 %s392_s16, 7  ;;  %2439 = vst [vmem:[#allocation21_spill] sm:$0xff] %v1953_v16  ;;  %v1365_v17 = vpack.c.bf16 %v1948_v14, %v1943_v13  ;;  %v1963_v18 = vld [vmem:[%s1895_s0 + $0x50] sm:$0xff]  ;;  %v1966_v19 = vld [vmem:[%s1895_s0 + $0x68] sm:$0xff]  ;;  %s1162_s23 = scalar_lea.sflag [#allocation4], %s1889_s10 }
  0x7c   : > { %1362 = vmatprep.subr.bf16.mxu0 %v1361_v10  ;;  %s1958_s11 = scalar_lea.vmem %s2379_s2, %s1355_s29  ;;  %2440 = vst [vmem:[#allocation22_spill] sm:$0xff] %v1963_v18  ;;  %2441 = vst [vmem:[#allocation23_spill] sm:$0xff] %v1966_v19  ;;  %v1969_v20 = vld [vmem:[%s1895_s0 + $0x78] sm:$0xff]  ;;  %v1974_v23 = vld [vmem:[%s1895_s0 + $0x60] sm:$0xff]  ;;  %v1367_v24 = vpack.c.bf16 %v1963_v18, %v1953_v16  ;;  %p2487_p0 = scmp.ne.s32.totalorder %s2425_s17, 0 }
  0x7d   : > { %2442 = vst [vmem:[#allocation24_spill] sm:$0xff] %v1969_v20  ;;  %v1465_v21 = vld [vmem:[%s1958_s11 + $0x4] ss:$8 sps:$4 sm:$0xff]   ;;  %v1467_v22 = vld [vmem:[%s1958_s11] ss:$8 sps:$4 sm:$0xff]   ;;  %2443 = vst [vmem:[#allocation25_spill] sm:$0xff] %v1974_v23  ;;  %v1369_v28 = vpack.c.bf16 %v1969_v20, %v1966_v19 }
  0x7e   : > { %609 = vmatprep.subr.bf16.mxu1 %v1465_v21  ;;  %v1468_v25 = vld [vmem:[%s1958_s11 + $0x14] ss:$8 sps:$4 sm:$0xff]   ;;  %v1470_v27 = vld [vmem:[%s1958_s11 + $0x10] ss:$8 sps:$4 sm:$0xff]   ;;  %v1986_v29 = vld [vmem:[%s1895_s0 + $0x88] sm:$0xff]  ;;  %s1671_s14 = smov [#allocation9]  }
  0x7f   : > { %1364 = vmatpush1.bf16.msra.mxu0 %v1363_v15  ;;  %v1980_v26 = vld [vmem:[%s1895_s0 + $0x70] sm:$0xff]  ;;  %610 = vmatpush1.bf16.msra.mxu1 %v1467_v22  ;;  %2445 = vst [vmem:[#allocation27_spill] sm:$0xff] %v1986_v29  ;;  %v1471_v30 = vld [vmem:[%s1958_s11 + $0x24] ss:$8 sps:$4 sm:$0xff]   ;;  %v1990_v31 = vld [vmem:[%s1895_s0 + $0x98] sm:$0xff]  ;;  %s1590_s22 = sshll.u32 %s1671_s14, 4  ;;  %s1591_s22 = int_to_ptr.vmem [resolvable:$false] %s1590_s22 }
  0x80   : > { %2444 = vst [vmem:[#allocation26_spill] sm:$0xff] %v1980_v26  ;;  %1366 = vmatprep.subr.bf16.mxu0 %v1365_v17  ;;  %611 = vmatprep.subr.bf16.mxu1 %v1468_v25  ;;  %2446 = vst [vmem:[#allocation28_spill] sm:$0xff] %v1990_v31  ;;  %v1371_v32 = vpack.c.bf16 %v1980_v26, %v1974_v23  ;;  %v1473_v33 = vld [vmem:[%s1958_s11 + $0x20] ss:$8 sps:$4 sm:$0xff]   ;;  %v1373_v35 = vpack.c.bf16 %v1990_v31, %v1986_v29  ;;  %v2001_v36 = vld [vmem:[%s1895_s0 + $0x90] sm:$0xff] }
  0x81   : > { %v1996_v34 = vld [vmem:[%s1895_s0 + $0x80] sm:$0xff]  ;;  %2448 = vst [vmem:[#allocation30_spill] sm:$0xff] %v2001_v36  ;;  %v1474_v37 = vld [vmem:[%s1958_s11 + $0x34] ss:$8 sps:$4 sm:$0xff]   ;;  %v2005_v38 = vld [vmem:[%s1895_s0 + $0xa8] sm:$0xff] }
  0x82   : > { %2447 = vst [vmem:[#allocation29_spill] sm:$0xff] %v1996_v34  ;;  %2449 = vst [vmem:[#allocation31_spill] sm:$0xff] %v2005_v38  ;;  %v2008_v39 = vld [vmem:[%s1895_s0 + $0xb8] sm:$0xff]  ;;  %v1375_v40 = vpack.c.bf16 %v2001_v36, %v1996_v34  ;;  %v2016_v43 = vld [vmem:[%s1895_s0 + $0xa0] sm:$0xff] }
  0x83   : > { %1368 = vmatpush1.bf16.msra.mxu0 %v1367_v24  ;;  %612 = vmatpush1.bf16.msra.mxu1 %v1470_v27  ;;  %2450 = vst [vmem:[#allocation32_spill] sm:$0xff] %v2008_v39  ;;  %v1476_v41 = vld [vmem:[%s1958_s11 + $0x30] ss:$8 sps:$4 sm:$0xff]   ;;  %v1377_v42 = vpack.c.bf16 %v2008_v39, %v2005_v38  ;;  %2451 = vst [vmem:[#allocation33_spill] sm:$0xff] %v2016_v43  ;;  %v1477_v45 = vld [vmem:[%s1958_s11 + $0x44] ss:$8 sps:$4 sm:$0xff]  }
  0x84   : > { %1370 = vmatprep.subr.bf16.mxu0 %v1369_v28  ;;  %613 = vmatprep.subr.bf16.mxu1 %v1471_v30  ;;  %v2019_v44 = vld [vmem:[%s1895_s0 + $0xb0] sm:$0xff]  ;;  %v2023_v46 = vld [vmem:[%s1895_s0 + $0xc8] sm:$0xff]  ;;  %v2026_v47 = vld [vmem:[%s1895_s0 + $0xd8] sm:$0xff] }
  0x85   : > { %2452 = vst [vmem:[#allocation34_spill] sm:$0xff] %v2019_v44  ;;  %2453 = vst [vmem:[#allocation35_spill] sm:$0xff] %v2023_v46  ;;  %v1479_v48 = vld [vmem:[%s1958_s11 + $0x40] ss:$8 sps:$4 sm:$0xff]   ;;  %v1379_v49 = vpack.c.bf16 %v2019_v44, %v2016_v43  ;;  %v1381_v51 = vpack.c.bf16 %v2026_v47, %v2023_v46  ;;  %v2037_v52 = vld [vmem:[%s1895_s0 + $0xd0] sm:$0xff] }
  0x86   : > { %2454 = vst [vmem:[#allocation36_spill] sm:$0xff] %v2026_v47  ;;  %v2032_v50 = vld [vmem:[%s1895_s0 + $0xc0] sm:$0xff]  ;;  %2456 = vst [vmem:[#allocation38_spill] sm:$0xff] %v2037_v52  ;;  %v1480_v53 = vld [vmem:[%s1958_s11 + $0x54] ss:$8 sps:$4 sm:$0xff]  }
  0x87   : > { %1372 = vmatpush1.bf16.msra.mxu0 %v1371_v32  ;;  %614 = vmatpush1.bf16.msra.mxu1 %v1473_v33  ;;  %2455 = vst [vmem:[#allocation37_spill] sm:$0xff] %v2032_v50  ;;  %v2041_v54 = vld [vmem:[%s1895_s0 + $0xe8] sm:$0xff]  ;;  %v2044_v55 = vld [vmem:[%s1895_s0 + $0xf8] sm:$0xff]  ;;  %v1383_v56 = vpack.c.bf16 %v2037_v52, %v2032_v50  ;;  %v2052_v59 = vld [vmem:[%s1895_s0 + $0xe0] sm:$0xff] }
  0x88   : > { %1374 = vmatprep.subr.bf16.mxu0 %v1373_v35  ;;  %615 = vmatprep.subr.bf16.mxu1 %v1474_v37  ;;  %2457 = vst [vmem:[#allocation39_spill] sm:$0xff] %v2041_v54  ;;  %2458 = vst [vmem:[#allocation40_spill] sm:$0xff] %v2044_v55  ;;  %v1482_v57 = vld [vmem:[%s1958_s11 + $0x50] ss:$8 sps:$4 sm:$0xff]   ;;  %v1385_v58 = vpack.c.bf16 %v2044_v55, %v2041_v54  ;;  %v1483_v61 = vld [vmem:[%s1958_s11 + $0x64] ss:$8 sps:$4 sm:$0xff]  }
  0x89   : > { %2459 = vst [vmem:[#allocation41_spill] sm:$0xff] %v2052_v59  ;;  %v2055_v60 = vld [vmem:[%s1895_s0 + $0xf0] sm:$0xff]  ;;  %v1485_v63 = vld [vmem:[%s1958_s11 + $0x60] ss:$8 sps:$4 sm:$0xff]   ;;  %v1488_v3 = vld [vmem:[%s1903_s25 + $0x4] ss:$8 sps:$4 sm:$0xff]  }
  0x8a   : > { %2460 = vst [vmem:[#allocation42_spill] sm:$0xff] %v2055_v60  ;;  %v1387_v62 = vpack.c.bf16 %v2055_v60, %v2052_v59  ;;  %v1489_v7 = vld [vmem:[%s1958_s11 + $0x74] ss:$8 sps:$4 sm:$0xff]   ;;  %v402_v9 = vld [vmem:[%s2381_s4] sm:$0xff]  ;;  %v1491_v17 = vld [vmem:[%s1958_s11 + $0x70] ss:$8 sps:$4 sm:$0xff]  }
  0x8b   : > { %1376 = vmatpush1.bf16.msra.mxu0 %v1375_v40  ;;  %616 = vmatpush1.bf16.msra.mxu1 %v1476_v41  ;;  %v1486_v10 = vld [vmem:[%s1903_s25] ss:$8 sps:$4 sm:$0xff]   ;;  %v1494_v21 = vld [vmem:[%s1903_s25 + $0x14] ss:$8 sps:$4 sm:$0xff]   ;;  %v1492_v24 = vld [vmem:[%s1903_s25 + $0x10] ss:$8 sps:$4 sm:$0xff]  }
  0x8c   : > { %1378 = vmatprep.subr.bf16.mxu0 %v1377_v42  ;;  %617 = vmatprep.subr.bf16.mxu1 %v1477_v45  ;;  %v833_v15 = vld [vmem:[%s2383_s6] sm:$0xff]  ;;  %v834_v22 = vld [vmem:[%s2383_s6 + $0x8] sm:$0xff]  ;;  %v836_v28 = vld [vmem:[%s2383_s6 + $0x18] sm:$0xff]  ;;  %s397_s0 = sld [smem:[#allocation2]]  ;;  %s2272_s11 = scalar_lea.vmem [#allocation9], %s1307_s26 }
  0x8d   : > { %859 = vperm.xlu1 %1463, %v833_v15   ;;  %v512_v25 = vld [vmem:[%s2382_s5] sm:$0xf]  ;;  %v1497_v27 = vld [vmem:[%s1903_s25 + $0x24] ss:$8 sps:$4 sm:$0xff]   ;;  %v1498_v33 = vld [vmem:[%s1903_s25 + $0x30] ss:$8 sps:$4 sm:$0xff]  }
  0x8e   : > { %v1495_v30 = vld [vmem:[%s1903_s25 + $0x20] ss:$8 sps:$4 sm:$0xff]   ;;  %v1503_v35 = vld [vmem:[%s1903_s25 + $0x44] ss:$8 sps:$4 sm:$0xff]   ;;  %v1506_v41 = vld [vmem:[%s1903_s25 + $0x54] ss:$8 sps:$4 sm:$0xff]  }
  0x8f   : > { %1380 = vmatpush1.bf16.msra.mxu0 %v1379_v49  ;;  %618 = vmatpush1.bf16.msra.mxu1 %v1479_v48  ;;  %v837_v32 = vld [vmem:[%s2383_s6 + $0x20] sm:$0xff]  ;;  %v838_v37 = vld [vmem:[%s2383_s6 + $0x28] sm:$0xff]  ;;  %v839_v42 = vld [vmem:[%s2383_s6 + $0x30] sm:$0xff]  ;;  %s1356_s26 = sshll.u32 %s1740_s9, 12  ;;  %s1175_s21 = sshll.u32 %s2272_s11, 4  ;;  %s2317_s21 = int_to_ptr.vmem [resolvable:$true] %s1175_s21 }
  0x90   : > { %1382 = vmatprep.subr.bf16.mxu0 %v1381_v51  ;;  %619 = vmatprep.subr.bf16.mxu1 %v1480_v53  ;;  %v1501_v40 = vld [vmem:[%s1903_s25 + $0x40] ss:$8 sps:$4 sm:$0xff]   ;;  %v1504_v45 = vld [vmem:[%s1903_s25 + $0x50] ss:$8 sps:$4 sm:$0xff]   ;;  %v1509_v48 = vld [vmem:[%s1903_s25 + $0x64] ss:$8 sps:$4 sm:$0xff]   ;;  %p1593_p10 = scmp.lt.s32.totalorder %s2317_s21, %s1591_s22 }
  0x91   : > { %864 = vperm.xlu1 %1463, %v834_v22   ;;  %v840_v49 = vld [vmem:[%s2383_s6 + $0x38] sm:$0xff]  ;;  %v1507_v51 = vld [vmem:[%s1903_s25 + $0x60] ss:$8 sps:$4 sm:$0xff]   ;;  %s1586_s1 = scalar_lea.vmem %s2317_s21, 4096 }
  0x92   : > { %v1512_v53 = vld [vmem:[%s1903_s25 + $0x74] ss:$8 sps:$4 sm:$0xff]   ;;  %v974_v15 = vld [vmem:[%s2384_s7 + $0x28] sm:$0xff]  ;;  %p1587_p5 = scmp.ne.s32.totalorder %s2317_s21, %s1586_s1 }
  0x93   : > { %1384 = vmatpush1.bf16.msra.mxu0 %v1383_v56  ;;  %620 = vmatpush1.bf16.msra.mxu1 %v1482_v57  ;;  %v841_v56 = vld [vmem:[%s2383_s6 + $0x40] sm:$0xff]  ;;  %v1510_v57 = vld [vmem:[%s1903_s25 + $0x70] ss:$8 sps:$4 sm:$0xff]  }
  0x94   : > { %1386 = vmatprep.subr.bf16.mxu0 %v1385_v58  ;;  %621 = vmatprep.subr.bf16.mxu1 %v1483_v61  ;;  %v842_v58 = vld [vmem:[%s2383_s6 + $0x48] sm:$0xff]  ;;  %v843_v61 = vld [vmem:[%s2383_s6 + $0x50] sm:$0xff]  ;;  %v980_v22 = vld [vmem:[%s2384_s7 + $0x58] sm:$0xff]  ;;  %p1588_p8 = pnand %p1587_p5, %p2487_p0 }
  0x95   : > { %874 = vperm.xlu1 %1463, %v836_v28  }
  0x96   : > { %p1589_p9 = pneg %p1588_p8 }
  0x97   : > { %1388 = vmatpush1.bf16.msra.mxu0 %v1387_v62  ;;  %622 = vmatpush1.bf16.msra.mxu1 %v1485_v63  ;;  %v844_v62 = vld [vmem:[%s2383_s6 + $0x58] sm:$0xff]  ;;  %v845_v63 = vld [vmem:[%s2383_s6 + $0x60] sm:$0xff] }
  0x98   : > { %749 = vmatprep.subr.bf16.mxu0 %v1488_v3  ;;  %623 = vmatprep.subr.bf16.mxu1 %v1489_v7  ;;  %v846_v3 = vld [vmem:[%s2383_s6 + $0x68] sm:$0xff]  ;;  %v848_v7 = vld [vmem:[%s2383_s6 + $0x78] sm:$0xff] }
  0x99   : > { %879 = vperm.xlu1 %1463, %v837_v32  }
  0x9a   : > { %500 = vmatmul.mubr.f32.vlgmr.msra.gmra.mrb[0].mxu0 %v402_v9  ;;  %v970_v9 = vld [vmem:[%s2384_s7 + $0x8] sm:$0xff] }
  0x9b   : > { %750 = vmatpush1.bf16.msra.mxu0 %v1486_v10  ;;  %781 = vmatprep.mubr.bf16.mxu0 %v1670_v8  ;;  %v1500_v8 = vld [vmem:[%s1903_s25 + $0x34] ss:$8 sps:$4 sm:$0xff]  }
  0x9c   : > { %624 = vmatpush1.bf16.msra.mxu1 %v1491_v17  ;;  %751 = vmatprep.subr.bf16.mxu0 %v1494_v21  ;;  %v972_v10 = vld [vmem:[%s2384_s7 + $0x18] sm:$0xff]  ;;  %v978_v21 = vld [vmem:[%s2384_s7 + $0x48] sm:$0xff] }
  0x9d   : > { %884 = vperm.xlu1 %1463, %v838_v37   ;;  %v976_v17 = vld [vmem:[%s2384_s7 + $0x38] sm:$0xff] }
  0x9f   : > { %752 = vmatpush1.bf16.msra.mxu0 %v1492_v24  ;;  %642 = vmatmul.mubr.bf16.vlgmr.msra.gmra.mrb[0].mxu1 %v512_v25  ;;  %v982_v24 = vld [vmem:[%s2384_s7 + $0x68] sm:$0xff] }
  0xa0   : > { %753 = vmatprep.subr.bf16.mxu0 %v1497_v27  ;;  %v509_v27 = vstv %s1314_s15 }
  0xa1   : > { %889 = vperm.xlu1 %1463, %v839_v42  }
  0xa3   : > { %754 = vmatpush1.bf16.msra.mxu0 %v1495_v30 }
  0xa4   : > { %755 = vmatprep.subr.bf16.mxu0 %v1500_v8 }
  0xa5   : > { %894 = vperm.xlu1 %1463, %v840_v49  }
  0xa7   : > { %756 = vmatpush1.bf16.msra.mxu0 %v1498_v33  ;;  %v650_v33 = vstv %s1315_s24  ;;  %s2315_s24 = scalar_lea.hbm %s2385_s8, %s1356_s26 }
  0xa8   : > { %757 = vmatprep.subr.bf16.mxu0 %v1503_v35 }
  0xa9   : > { %899 = vperm.xlu1 %1463, %v841_v56  }
  0xab   : > { %758 = vmatpush1.bf16.msra.mxu0 %v1501_v40 }
  0xac   : > { %759 = vmatprep.subr.bf16.mxu0 %v1506_v41 }
  0xad   : > { %904 = vperm.xlu1 %1463, %v842_v58  }
  0xaf   : > { %760 = vmatpush1.bf16.msra.mxu0 %v1504_v45 }
  0xb0   : > { %761 = vmatprep.subr.bf16.mxu0 %v1509_v48 }
  0xb1   : > { %909 = vperm.xlu1 %1463, %v843_v61  }
  0xb3   : > { %762 = vmatpush1.bf16.msra.mxu0 %v1507_v51 }
  0xb4   : > { %763 = vmatprep.subr.bf16.mxu0 %v1512_v53 }
  0xb5   : > { %914 = vperm.xlu1 %1463, %v844_v62  }
  0xb7   : > { %764 = vmatpush1.bf16.msra.mxu0 %v1510_v57 }
  0xb9   : > { %919 = vperm.xlu1 %1463, %v845_v63  }
  0xba   : > { %782 = vmatmul.mubr.bf16.vlgmr.msra.gmra.mrb[4].mxu0 %v512_v25  ;;  %v984_v25 = vld [vmem:[%s2384_s7 + $0x78] sm:$0xff] }
  0xbd   : > { %924 = vperm.xlu1 %1463, %v846_v3  }
  0xc1   : > { %934 = vperm.xlu1 %1463, %v848_v7  }
  0xc5   : > { %992 = vperm.xlu1 %1463, %v970_v9  }
  0xc9   : > { %1002 = vperm.xlu1 %1463, %v972_v10  }
  0xcd   : > { %1012 = vperm.xlu1 %1463, %v974_v15  }
  0xd1   : > { %1022 = vperm.xlu1 %1463, %v976_v17  }
  0xd5   : > { %1032 = vperm.xlu1 %1463, %v978_v21  }
  0xd9   : > { %1042 = vperm.xlu1 %1463, %v980_v22  }
  0xdd   : > { %1052 = vperm.xlu1 %1463, %v982_v24   ;;  %v835_v24 = vld [vmem:[%s2383_s6 + $0x10] sm:$0xff] }
  0xe1   : > { %1062 = vperm.xlu1 %1463, %v984_v25   ;;  %v847_v25 = vld [vmem:[%s2383_s6 + $0x70] sm:$0xff] }
 0x16d   : > { %v2152_v28 = vpop.f32.mrb[0].mxu0 }
 0x16e   : > { %v2154_v30 = vpop.f32.mrb[1].mxu0  ;;  %v510_v8 = vadd.f32 %v509_v27, %v2152_v28 }
 0x16f   : > { %v511_v32 = vadd.f32 %v509_v27, %v2154_v30  ;;  %v969_v27 = vld [vmem:[%s2384_s7] sm:$0xff] }
 0x170   : > { %v794_v37 = vrot.slane %v510_v8, 1  ;;  %v971_v8 = vld [vmem:[%s2384_s7 + $0x10] sm:$0xff] }
 0x171   : > { %v795_v42 = vrot.slane %v511_v32, 1  ;;  %v973_v32 = vld [vmem:[%s2384_s7 + $0x20] sm:$0xff] }
 0x172   : > { %v643_v35 = vpop.f32.mrb[0].mxu1 }
 0x173   : > { %v651_v40 = vadd.f32 %v650_v33, %v643_v35  ;;  %v645_v41 = vpop.f32.mrb[1].mxu1  ;;  %v977_v35 = vld [vmem:[%s2384_s7 + $0x40] sm:$0xff] }
 0x174   : > { %v652_v45 = vadd.f32 %v650_v33, %v645_v41  ;;  %v647_v48 = vpop.f32.mrb[2].mxu1  ;;  %v983_v41 = vld [vmem:[%s2384_s7 + $0x70] sm:$0xff] }
 0x175   : > { %v798_v49 = vmul.f32 %v794_v37, %v651_v40  ;;  %v648_v51 = vpop.f32.mrb[3].mxu1  ;;  %v981_v40 = vld [vmem:[%s2384_s7 + $0x60] sm:$0xff] }
 0x176   : > { %v799_v53 = vmul.f32 %v795_v42, %v652_v45 }
 0x177   : > { %v801_v56 = vsel %vm800_vm0, %v798_v49, 0.0 }
 0x178   : > { %v802_v57 = vsel %vm800_vm0, %v799_v53, 0.0 }
 0x179   : > { %v803_v58 = vadd.f32 %v802_v57, %v801_v56 }
 0x17b   : > { %804 = vadd.xlane.f32.xlu0 %v803_v58 }
 0x18d   : > { %v783_v61 = vpop.f32.mrb[4].mxu0 }
 0x18e   : > { %v790_v62 = vadd.f32 %v783_v61, %v650_v33  ;;  %v785_v63 = vpop.f32.mrb[5].mxu0 }
 0x18f   : > { %v791_v3 = vadd.f32 %v785_v63, %v650_v33  ;;  %v787_v7 = vpop.f32.mrb[6].mxu0  ;;  %v975_v33 = vld [vmem:[%s2384_s7 + $0x30] sm:$0xff] }
 0x190   : > { %v813_v9 = vmul.f32 %v794_v37, %v790_v62  ;;  %v788_v10 = vpop.f32.mrb[7].mxu0  ;;  %v979_v37 = vld [vmem:[%s2384_s7 + $0x50] sm:$0xff] }
 0x191   : > { %v814_v15 = vmul.f32 %v795_v42, %v791_v3  ;;  %v860_v42 = vpop.permute.xlu1 %859 }
 0x192   : > { %v815_v17 = vsel %vm800_vm0, %v813_v9, 0.0 }
 0x193   : > { %v816_v21 = vsel %vm800_vm0, %v814_v15, 0.0 }
 0x194   : > { %v817_v22 = vadd.f32 %v816_v21, %v815_v17 }
 0x195   : > { %v2192_v45 = vpop.permute.xlu1 %864 }
 0x196   : > { %818 = vadd.xlane.f32.xlu0 %v817_v22 }
 0x199   : > { %v2194_v48 = vpop.permute.xlu1 %874 }
 0x19d   : > { %v2196_v56 = vpop.permute.xlu1 %879 }
 0x1a1   : > { %v2198_v62 = vpop.permute.xlu1 %884 }
 0x1a5   : > { %v2200_v3 = vpop.permute.xlu1 %889 }
 0x1a9   : > { %v2202_v7 = vpop.permute.xlu1 %894 }
 0x1ac   : > { %869 = vperm.xlu0 %1464, %v835_v24  }
 0x1ad   : > { %v2204_v15 = vpop.permute.xlu1 %899 }
 0x1b0   : > { %929 = vperm.xlu0 %1464, %v847_v25  }
 0x1b1   : > { %v905_v24 = vpop.permute.xlu1 %904 }
 0x1b4   : > { %987 = vperm.xlu0 %1464, %v969_v27  }
 0x1b8   : > { %997 = vperm.xlu0 %1464, %v971_v8   ;;  %v910_v8 = vpop.permute.xlu1 %909 }
 0x1bc   : > { %1007 = vperm.xlu0 %1464, %v973_v32   ;;  %v915_v32 = vpop.permute.xlu1 %914 }
 0x1c0   : > { %1017 = vperm.xlu0 %1464, %v975_v33   ;;  %v920_v33 = vpop.permute.xlu1 %919 }
 0x1c4   : > { %1027 = vperm.xlu0 %1464, %v977_v35   ;;  %v925_v35 = vpop.permute.xlu1 %924 }
 0x1c8   : > { %1037 = vperm.xlu0 %1464, %v979_v37  }
 0x1cc   : > { %1047 = vperm.xlu0 %1464, %v981_v40   ;;  %v2206_v40 = vpop.permute.xlu1 %934 }
 0x1d0   : > { %1057 = vperm.xlu0 %1464, %v983_v41  }
 0x208   : > { %v805_v49 = vpop.xlane.xlu0 %804 }
 0x209   : > { %v806_v51 = vrot.slane %v805_v49, 4 }
 0x20b   : > { %v807_v53 = vadd.f32 %v806_v51, %v805_v49  ;;  %v2208_v49 = vpop.permute.xlu1 %992 }
 0x20d   : > { %v808_v57 = vrot.slane %v807_v53, 2 }
 0x20f   : > { %v809_v58 = vadd.f32 %v808_v57, %v807_v53  ;;  %v2212_v53 = vpop.permute.xlu1 %1002 }
 0x211   : > { %v810_v61 = vrot.slane %v809_v58, 1 }
 0x213   : > { %v811_v63 = vadd.f32 %v810_v61, %v809_v58  ;;  %v2216_v58 = vpop.permute.xlu1 %1012 }
 0x215   : > { %1389 = vpush %v811_v63  ;;  %v849_v63 = vlaneseq }
 0x223   : > { %v819_v9 = vpop.xlane.xlu0 %818 }
 0x224   : > { %v820_v10 = vrot.slane %v819_v9, 4 }
 0x226   : > { %v821_v17 = vadd.f32 %v820_v10, %v819_v9  ;;  %v2220_v9 = vpop.permute.xlu1 %1022 }
 0x228   : > { %v822_v21 = vrot.slane %v821_v17, 2 }
 0x22a   : > { %v823_v22 = vadd.f32 %v822_v21, %v821_v17  ;;  %v850_v17 = vshrl.u32 %v849_v63, 7  ;;  %v506_v21 = vstv %s1313_s19  ;;  %v1033_v60 = vpop.permute.xlu1 %1032 }
 0x22b   : > { %v870_v37 = vpop.permute.xlu0 %869 }
 0x22c   : > { %v824_v25 = vrot.slane %v823_v22, 1 }
 0x22e   : > { %v825_v27 = vadd.f32 %v824_v25, %v823_v22  ;;  %v507_v22 = vadd.f32 %v506_v21, %v2152_v28  ;;  %v508_v25 = vadd.f32 %v506_v21, %v2154_v30 }
 0x22f   : > { %v930_v41 = vpop.permute.xlu0 %929 }
 0x230   : > { %1391 = vpush %v825_v27  ;;  %v851_v27 = vsub.s32 0, %v850_v17  ;;  %v1043_v17 = vpop.permute.xlu1 %1042 }
 0x233   : > { %v2210_v51 = vpop.permute.xlu0 %987 }
 0x234   : > { %v1053_v13 = vpop.permute.xlu1 %1052 }
 0x237   : > { %v2214_v57 = vpop.permute.xlu0 %997 }
 0x23b   : > { %v2218_v61 = vpop.permute.xlu0 %1007 }
 0x23f   : > { %v2222_v10 = vpop.permute.xlu0 %1017 }
 0x243   : > { %v1028_v54 = vpop.permute.xlu0 %1027 }
 0x246   : > { %s1390_s16 = spop %1389 }
 0x247   : > { %s827_s25 = smul.f32 %s1390_s16, %s397_s0  ;;  %v1038_v21 = vpop.permute.xlu0 %1037  ;;  %s1592_s0 = scalar_lea.vmem %s1591_s22, 8192 }
 0x248   : > { %p1594_p6 = scmp.lt.s32.totalorder %s1592_s0, %s1586_s1 }
 0x24a   : > { %p1595_p11 = por %p1594_p6, %p1593_p10 }
 0x24b   : > { %v1048_v16 = vpop.permute.xlu0 %1047 }
 0x24c   : > { %p1596_p7 = pnand %p1595_p11, %p1589_p9 }
 0x261   : > { %s1392_s29 = spop %1391 }
 0x262   : > { %s828_s12 = smul.f32 %s1392_s29, %s1312_s20 }
 0x264   : > { %s829_s13 = sadd.f32 %s828_s12, %s827_s25 }
 0x266   : > { %v830_v55 = vstv %s829_s13 }
 0x267   : > { %v831_v59 = vmul.f32 %v830_v55, %v507_v22  ;;  %v832_v47 = vmul.f32 %v830_v55, %v508_v25 }
 0x269   : > { %v852_v52 = vrot.slane %v831_v59, %v851_v27  ;;  %v856_v46 = vrot.slane %v832_v47, %v851_v27 }
 0x26b   : > { %v937_v50 = vmul.f32 %v860_v42, %v852_v52  ;;  %v938_v39 = vmul.f32 %v860_v42, %v856_v46  ;;  %v939_v44 = vmul.f32 %v2192_v45, %v852_v52  ;;  %v940_v63 = vmul.f32 %v2192_v45, %v856_v46 }
 0x26c   : > { %v941_v38 = vmul.f32 %v870_v37, %v852_v52  ;;  %v942_v43 = vmul.f32 %v870_v37, %v856_v46  ;;  %v943_v28 = vmul.f32 %v2194_v48, %v852_v52  ;;  %v944_v30 = vmul.f32 %v2194_v48, %v856_v46 }
 0x26d   : > { %v945_v31 = vmul.f32 %v2196_v56, %v852_v52  ;;  %v946_v55 = vmul.f32 %v2196_v56, %v856_v46  ;;  %v947_v47 = vmul.f32 %v2198_v62, %v852_v52  ;;  %v948_v59 = vmul.f32 %v2198_v62, %v856_v46 }
 0x26e   : > { %v949_v42 = vmul.f32 %v2200_v3, %v852_v52  ;;  %v950_v45 = vmul.f32 %v2200_v3, %v856_v46  ;;  %v951_v37 = vmul.f32 %v2202_v7, %v852_v52  ;;  %v952_v22 = vmul.f32 %v2202_v7, %v856_v46 }
 0x26f   : > { %v953_v48 = vmul.f32 %v2204_v15, %v852_v52  ;;  %v954_v25 = vmul.f32 %v2204_v15, %v856_v46  ;;  %v955_v27 = vmul.f32 %v905_v24, %v852_v52  ;;  %v956_v36 = vmul.f32 %v905_v24, %v856_v46 }
 0x270   : > { %v957_v29 = vmul.f32 %v910_v8, %v852_v52  ;;  %v958_v56 = vmul.f32 %v910_v8, %v856_v46  ;;  %v959_v34 = vmul.f32 %v915_v32, %v852_v52  ;;  %v960_v20 = vmul.f32 %v915_v32, %v856_v46 }
 0x271   : > { %v961_v26 = vmul.f32 %v920_v33, %v852_v52  ;;  %v962_v62 = vmul.f32 %v920_v33, %v856_v46  ;;  %v963_v19 = vmul.f32 %v925_v35, %v852_v52  ;;  %v964_v23 = vmul.f32 %v925_v35, %v856_v46 }
 0x272   : > { %v965_v14 = vmul.f32 %v930_v41, %v852_v52  ;;  %v966_v3 = vmul.f32 %v930_v41, %v856_v46  ;;  %v967_v18 = vmul.f32 %v2206_v40, %v852_v52  ;;  %v968_v7 = vmul.f32 %v2206_v40, %v856_v46 }
 0x273   : > { %v1065_v15 = vadd.f32 %v2210_v51, %v937_v50  ;;  %v1066_v24 = vadd.f32 %v2210_v51, %v938_v39  ;;  %v1067_v8 = vadd.f32 %v2208_v49, %v939_v44  ;;  %v1068_v32 = vadd.f32 %v2208_v49, %v940_v63 }
 0x274   : > { %v1069_v33 = vadd.f32 %v2214_v57, %v941_v38  ;;  %v1070_v35 = vadd.f32 %v2214_v57, %v942_v43  ;;  %v1071_v41 = vadd.f32 %v2212_v53, %v943_v28  ;;  %v1072_v52 = vadd.f32 %v2212_v53, %v944_v30 }
 0x275   : > { %v1073_v46 = vadd.f32 %v2218_v61, %v945_v31  ;;  %v1074_v40 = vadd.f32 %v2218_v61, %v946_v55  ;;  %v1075_v50 = vadd.f32 %v2216_v58, %v947_v47  ;;  %v1076_v39 = vadd.f32 %v2216_v58, %v948_v59  ;;  %v1063_v55 = vpop.permute.xlu1 %1062  ;;  %v1058_v47 = vpop.permute.xlu0 %1057 }
 0x276   : > { %v1077_v44 = vadd.f32 %v2222_v10, %v949_v42  ;;  %v1078_v49 = vadd.f32 %v2222_v10, %v950_v45  ;;  %v1079_v38 = vadd.f32 %v2220_v9, %v951_v37  ;;  %v1080_v43 = vadd.f32 %v2220_v9, %v952_v22  ;;  %v2469_v22 = vld [vmem:[#allocation26_spill] sm:$0xff] }
 0x277   : > { %v1081_v51 = vadd.f32 %v1028_v54, %v953_v48  ;;  %v1082_v57 = vadd.f32 %v1028_v54, %v954_v25  ;;  %v1083_v63 = vadd.f32 %v1033_v60, %v955_v27  ;;  %v1084_v53 = vadd.f32 %v1033_v60, %v956_v36  ;;  %v2470_v25 = vld [vmem:[#allocation24_spill] sm:$0xff] }
 0x278   : > { %v1085_v28 = vadd.f32 %v1038_v21, %v957_v29  ;;  %v1086_v31 = vadd.f32 %v1038_v21, %v958_v56  ;;  %v1087_v30 = vadd.f32 %v1043_v17, %v959_v34  ;;  %v1088_v61 = vadd.f32 %v1043_v17, %v960_v20  ;;  %v2465_v17 = vld [vmem:[#allocation22_spill] sm:$0xff]  ;;  %v2471_v56 = vld [vmem:[#allocation29_spill] sm:$0xff] }
 0x279   : > { %v1089_v6 = vadd.f32 %v1048_v16, %v961_v26  ;;  %v1090_v58 = vadd.f32 %v1048_v16, %v962_v62  ;;  %v1091_v59 = vadd.f32 %v1053_v13, %v963_v19  ;;  %v1092_v42 = vadd.f32 %v1053_v13, %v964_v23  ;;  %v2461_v16 = vld [vmem:[#allocation18_spill] sm:$0xff]  ;;  %v2462_v13 = vld [vmem:[#allocation17_spill] sm:$0xff] }
 0x27a   : > { %v1093_v12 = vadd.f32 %v1058_v47, %v965_v14  ;;  %v1094_v10 = vadd.f32 %v1058_v47, %v966_v3  ;;  %v1095_v45 = vadd.f32 %v1063_v55, %v967_v18  ;;  %v1096_v37 = vadd.f32 %v1063_v55, %v968_v7  ;;  %v2463_v23 = vld [vmem:[#allocation21_spill] sm:$0xff]  ;;  %v2464_v18 = vld [vmem:[#allocation19_spill] sm:$0xff]  ;;  %v2486_v47 = vld [vmem:[#allocation40_spill] sm:$0xff] }
 0x27b   : > { %v1097_v9 = vadd.f32 %v1065_v15, %v1916_v2  ;;  %v1098_v54 = vadd.f32 %v1066_v24, %v1910_v0  ;;  %v1099_v29 = vadd.f32 %v1067_v8, %v1922_v4  ;;  %v1100_v34 = vadd.f32 %v1068_v32, %v1913_v1  ;;  %v2466_v0 = vld [vmem:[#allocation20_spill] sm:$0xff]  ;;  %v2467_v1 = vld [vmem:[#allocation25_spill] sm:$0xff]  ;;  %v2472_v3 = vld [vmem:[#allocation27_spill] sm:$0xff] }
 0x27c   : > { %v1101_v20 = vadd.f32 %v1069_v33, %v1936_v11  ;;  %v1102_v26 = vadd.f32 %v1070_v35, %v1925_v5  ;;  %v1103_v19 = vadd.f32 %v1071_v41, %v2461_v16  ;;  %v1104_v14 = vadd.f32 %v1072_v52, %v2462_v13  ;;  %v2468_v5 = vld [vmem:[#allocation23_spill] sm:$0xff]  ;;  %v2473_v15 = vld [vmem:[#allocation30_spill] sm:$0xff]  ;;  %v2474_v8 = vld [vmem:[#allocation28_spill] sm:$0xff] }
 0x27d   : > { %v1105_v36 = vadd.f32 %v1073_v46, %v2463_v23  ;;  %v1106_v60 = vadd.f32 %v1074_v40, %v2464_v18  ;;  %v1107_v2 = vadd.f32 %v1075_v50, %v2465_v17  ;;  %v1108_v21 = vadd.f32 %v1076_v39, %v2466_v0  ;;  %1129 = vst [vmem:[%s2272_s11] sm:$0xff] %v1097_v9  ;;  %v2475_v33 = vld [vmem:[#allocation33_spill] sm:$0xff]  ;;  %v2476_v41 = vld [vmem:[#allocation31_spill] sm:$0xff]  ;;  %v2477_v46 = vld [vmem:[#allocation34_spill] sm:$0xff] }
 0x27e   : > { %1130 = vst [vmem:[%s2272_s11 + $0x8] sm:$0xff] %v1098_v54  ;;  %1131 = vst [vmem:[%s2272_s11 + $0x10] sm:$0xff] %v1099_v29  ;;  %v1109_v4 = vadd.f32 %v1077_v44, %v2467_v1  ;;  %v1110_v11 = vadd.f32 %v1078_v49, %v2468_v5  ;;  %v1111_v48 = vadd.f32 %v1079_v38, %v2469_v22  ;;  %v2478_v50 = vld [vmem:[#allocation32_spill] sm:$0xff]  ;;  %v2479_v44 = vld [vmem:[#allocation37_spill] sm:$0xff] }
 0x27f   : > { %1132 = vst [vmem:[%s2272_s11 + $0x18] sm:$0xff] %v1100_v34  ;;  %v1112_v27 = vadd.f32 %v1080_v43, %v2470_v25  ;;  %1133 = vst [vmem:[%s2272_s11 + $0x20] sm:$0xff] %v1101_v20  ;;  %v1113_v62 = vadd.f32 %v1081_v51, %v2471_v56  ;;  %v1114_v7 = vadd.f32 %v1082_v57, %v2472_v3  ;;  %v2480_v38 = vld [vmem:[#allocation35_spill] sm:$0xff]  ;;  %v2481_v51 = vld [vmem:[#allocation38_spill] sm:$0xff] }
 0x280   : > { %1134 = vst [vmem:[%s2272_s11 + $0x28] sm:$0xff] %v1102_v26  ;;  %1135 = vst [vmem:[%s2272_s11 + $0x30] sm:$0xff] %v1103_v19  ;;  %v1115_v24 = vadd.f32 %v1083_v63, %v2473_v15  ;;  %v1116_v32 = vadd.f32 %v1084_v53, %v2474_v8  ;;  %v1117_v35 = vadd.f32 %v1085_v28, %v2475_v33  ;;  %v2482_v63 = vld [vmem:[#allocation36_spill] sm:$0xff] }
 0x281   : > { %1136 = vst [vmem:[%s2272_s11 + $0x38] sm:$0xff] %v1104_v14  ;;  %1137 = vst [vmem:[%s2272_s11 + $0x40] sm:$0xff] %v1105_v36  ;;  %v1118_v52 = vadd.f32 %v1086_v31, %v2476_v41  ;;  %v1119_v40 = vadd.f32 %v1087_v30, %v2477_v46  ;;  %v1120_v39 = vadd.f32 %v1088_v61, %v2478_v50  ;;  %v2484_v31 = vld [vmem:[#allocation39_spill] sm:$0xff]  ;;  %v2485_v61 = vld [vmem:[#allocation42_spill] sm:$0xff] }
 0x282   : > { %1138 = vst [vmem:[%s2272_s11 + $0x48] sm:$0xff] %v1106_v60  ;;  %1139 = vst [vmem:[%s2272_s11 + $0x50] sm:$0xff] %v1107_v2  ;;  %v1121_v49 = vadd.f32 %v1089_v6, %v2479_v44  ;;  %v1122_v43 = vadd.f32 %v1090_v58, %v2480_v38  ;;  %v1123_v57 = vadd.f32 %v1091_v59, %v2481_v51  ;;  %v2483_v6 = vld [vmem:[#allocation41_spill] sm:$0xff] }
 0x283   : > { %1140 = vst [vmem:[%s2272_s11 + $0x58] sm:$0xff] %v1108_v21  ;;  %1141 = vst [vmem:[%s2272_s11 + $0x60] sm:$0xff] %v1109_v4  ;;  %v1124_v53 = vadd.f32 %v1092_v42, %v2482_v63  ;;  %v1125_v28 = vadd.f32 %v1093_v12, %v2483_v6  ;;  %v1126_v30 = vadd.f32 %v1094_v10, %v2484_v31 }
 0x284   : > { %1142 = vst [vmem:[%s2272_s11 + $0x68] sm:$0xff] %v1110_v11  ;;  %1143 = vst [vmem:[%s2272_s11 + $0x70] sm:$0xff] %v1111_v48  ;;  %v1127_v55 = vadd.f32 %v1095_v45, %v2485_v61  ;;  %v1128_v58 = vadd.f32 %v1096_v37, %v2486_v47 }
 0x285   : > { %1144 = vst [vmem:[%s2272_s11 + $0x78] sm:$0xff] %v1112_v27  ;;  %1145 = vst [vmem:[%s2272_s11 + $0x80] sm:$0xff] %v1113_v62 }
 0x286   : > { %1146 = vst [vmem:[%s2272_s11 + $0x88] sm:$0xff] %v1114_v7  ;;  %1147 = vst [vmem:[%s2272_s11 + $0x90] sm:$0xff] %v1115_v24 }
 0x287   : > { %1148 = vst [vmem:[%s2272_s11 + $0x98] sm:$0xff] %v1116_v32  ;;  %1149 = vst [vmem:[%s2272_s11 + $0xa0] sm:$0xff] %v1117_v35 }
 0x288   : > { %1150 = vst [vmem:[%s2272_s11 + $0xa8] sm:$0xff] %v1118_v52  ;;  %1151 = vst [vmem:[%s2272_s11 + $0xb0] sm:$0xff] %v1119_v40 }
 0x289   : > { %1152 = vst [vmem:[%s2272_s11 + $0xb8] sm:$0xff] %v1120_v39  ;;  %1153 = vst [vmem:[%s2272_s11 + $0xc0] sm:$0xff] %v1121_v49 }
 0x28a   : > { %1154 = vst [vmem:[%s2272_s11 + $0xc8] sm:$0xff] %v1122_v43  ;;  %1155 = vst [vmem:[%s2272_s11 + $0xd0] sm:$0xff] %v1123_v57 }
 0x28b   : > { %1156 = vst [vmem:[%s2272_s11 + $0xd8] sm:$0xff] %v1124_v53  ;;  %1157 = vst [vmem:[%s2272_s11 + $0xe0] sm:$0xff] %v1125_v28 }
 0x28c   : > { %1158 = vst [vmem:[%s2272_s11 + $0xe8] sm:$0xff] %v1126_v30  ;;  %1159 = vst [vmem:[%s2272_s11 + $0xf0] sm:$0xff] %v1127_v55 }
 0x28d   : > { %1160 = vst [vmem:[%s2272_s11 + $0xf8] sm:$0xff] %v1128_v58 }
 0x28e   : > { %1599 = shalt.err (!%p1596_p7)
}
 0x28f   : > { %s1600_s19 = scalar_lea.hbm %s2315_s24, 4096  ;;  %s1604_s25 = scalar_lea.hbm %s2385_s8, 8192 }
 0x290   : > { %p1601_p2 = scmp.ne.s32.totalorder %s2315_s24, %s1600_s19  ;;  %p1605_p12 = scmp.lt.u32.totalorder %s2315_s24, %s2385_s8 }
 0x291   : > { %p1606_p3 = scmp.lt.u32.totalorder %s1604_s25, %s1600_s19  ;;  %p1608_p5 = scmp.lt.u32.totalorder %s1600_s19, %s2315_s24 }
 0x292   : > { %p1602_p4 = pnand %p1601_p2, %p2487_p0 }
 0x293   : > { %p1607_p13 = por %p1606_p3, %p1605_p12 }
 0x294   : > { %p1603_p1 = pneg %p1602_p4 }
 0x295   : > { %p1609_p8 = por %p1608_p5, %p1607_p13 }
 0x297   : > { %p1610_p9 = pnand %p1609_p8, %p1603_p1 }
 0x299   : > { %1613 = shalt.err (!%p1610_p9)
}
 0x29a   : > { %s1672_s13 = smov 256   ;;  %s1673_s11 = smov 16  }
 0x29b   : > { %1401 = dma.vmem_to_hbm [thread:$0]  (%p2487_p0), %s2317_s21, 4096, %s2315_s24, %s1162_s23, %s1672_s13, %s1672_s13, %s1673_s11  }
 0x29c PF: > { %s1190_s26 = sand.u32 1, %s1648_s27   ;;  %p2488_p10 = scmp.ne.s32.totalorder %s2426_s18, 0 }
 0x29d   : > { %p2489_p6 = scmp.ge.s32.totalorder %s1660_s30, 2  ;;  %s1191_s9 = scalar_lea.sflag [#allocation4], %s1190_s26 }
 0x29f   : > { %p1415_p11 = pnand %p2489_p6, %p2488_p10 }
 0x2a1   : > { %1643 = dma.done.wait (!%p1415_p11), %s1191_s9, 4096  }
 0x2a2   : > { %1645 = vsyncadd (!%p1415_p11), %s1191_s9, 4294963200  ;;  %s2490_s30 = sld [smem:[#allocation15_spill]]  ;;  %s2491_s15 = sld [smem:[#allocation14_spill]] }
 0x2a3   : > { %s2492_s29 = sld [smem:[#allocation16_spill]]  ;;  %s2493_s27 = smov %s1652_s28 }
 0x2a8   : > { %p25_p7 = scmp.ge.s32.totalorder %s2490_s30, 4   ;;  %s2494_s28 = smov %s2491_s15 }
 0x2aa   :  { %27 = sbr.rel (!%p25_p7) target bundleno = 11 (0xb), region = 118 }
 0x2b1   :  { %1196 = vsyncpa [#allocation3], 1 }
 0x2b2   :  { %1198 = vsyncpa [#allocation3 + $0x1], 1 }
 0x2b3   :  { %1199 = vsyncpa [#allocation8], 1 }
 0x2b4   :  { %1201 = vsyncpa [#allocation8 + $0x1], 1 }
 0x2b5   :  { %1202 = vsyncpa [#allocation4], 1 }
 0x2b6   :  { %1204 = vsyncpa [#allocation4 + $0x1], 1 }
 0x2b7   :  { %1205 = vsyncpa [#allocation5], 1 }
 0x2b8   :  { %1207 = vsyncpa [#allocation5 + $0x1], 1 }

</bundles_post_ra>
